<compile_context>
chip_gen: v7x
topology: tpu7x:2x2x1
jax: 0.10.0
libtpu: 0.0.40
codegen_flags: <defaults>
</compile_context>

<pallas_src>
import math

import jax
import jax.numpy as jnp
from jax import lax
from jax.experimental import pallas as pl
from jax.experimental.pallas import tpu as pltpu


MIB = 1024 * 1024


# ----------------------------- tiling helpers ------------------------------

def _sublane_align(dtype):
    """Sublane multiple for the second-to-last block dim (dtype dependent)."""
    itemsize = jnp.dtype(dtype).itemsize
    return {4: 8, 2: 16, 1: 32}.get(itemsize, 8)


def _pick_tile(dim, pref, align):
    """Largest tile <= pref that divides dim and is a multiple of align,
    else the full dim (always legal: block == full array extent)."""
    if dim <= pref:
        return dim
    t = (pref // align) * align
    while t >= align:
        if dim % t == 0:
            return t
        t -= align
    return dim


# ----------------------------- fused QKV projection -------------------------

def _qkv_kernel(x_ref, wq_ref, wk_ref, wv_ref, bq_ref, bk_ref, bv_ref,
                q_ref, k_ref, v_ref, accq, acck, accv):
    """Q/K/V = x @ W{q,k,v}^T + b{q,k,v}; K-reduction over grid axis 2.

    x_ref: (tm, tk); w*_ref: (tn, tk) torch-Linear layout; b*_ref: (1, tn);
    outputs (tm, tn); acc*: f32 (tm, tn) scratch. x block is loaded once per
    grid step and feeds all three MXU contractions.
    """
    @pl.when(pl.program_id(2) == 0)
    def _():
        accq[...] = jnp.zeros_like(accq)
        acck[...] = jnp.zeros_like(acck)
        accv[...] = jnp.zeros_like(accv)

    x = x_ref[...]
    dn = (((1,), (1,)), ((), ()))   # contract Din with Din (no transpose)
    accq[...] += lax.dot_general(x, wq_ref[...], dimension_numbers=dn,
                                 preferred_element_type=jnp.float32)
    acck[...] += lax.dot_general(x, wk_ref[...], dimension_numbers=dn,
                                 preferred_element_type=jnp.float32)
    accv[...] += lax.dot_general(x, wv_ref[...], dimension_numbers=dn,
                                 preferred_element_type=jnp.float32)

    @pl.when(pl.program_id(2) == pl.num_programs(2) - 1)
    def _():
        q_ref[...] = (accq[...] + bq_ref[...]).astype(q_ref.dtype)
        k_ref[...] = (acck[...] + bk_ref[...]).astype(k_ref.dtype)
        v_ref[...] = (accv[...] + bv_ref[...]).astype(v_ref.dtype)


def qkv_proj_pallas(x2d, Wq, Wk, Wv, bq, bk, bv, *, tm=512, tn=512, tk=512):
    """x2d: (M, Din); W*: (Dout, Din) torch layout; b*: (Dout,).
    Returns (Q, K, V), each (M, Dout)."""
    M, Din = x2d.shape
    Dout = Wq.shape[0]
    tm = _pick_tile(M, tm, _sublane_align(x2d.dtype))
    tn = _pick_tile(Dout, tn, 128)
    tk = _pick_tile(Din, tk, 128)
    grid = (M // tm, Dout // tn, Din // tk)

    x_spec = pl.BlockSpec((tm, tk), lambda i, j, k: (i, k))
    w_spec = pl.BlockSpec((tn, tk), lambda i, j, k: (j, k))
    b_spec = pl.BlockSpec((1, tn), lambda i, j, k: (0, j))
    o_spec = pl.BlockSpec((tm, tn), lambda i, j, k: (i, j))

    cost = pl.CostEstimate(
        flops=3 * 2 * M * Dout * Din,
        transcendentals=0,
        bytes_accessed=4 * (M * Din + 3 * Dout * Din + 3 * M * Dout + 3 * Dout))

    out_shape = tuple(jax.ShapeDtypeStruct((M, Dout), x2d.dtype) for _ in range(3))
    return pl.pallas_call(
        _qkv_kernel,
        out_shape=out_shape,
        grid_spec=pltpu.PrefetchScalarGridSpec(
            num_scalar_prefetch=0,
            grid=grid,
            in_specs=[x_spec, w_spec, w_spec, w_spec, b_spec, b_spec, b_spec],
            out_specs=[o_spec, o_spec, o_spec],
            scratch_shapes=[pltpu.VMEM((tm, tn), jnp.float32)] * 3),
        compiler_params=pltpu.CompilerParams(
            dimension_semantics=("parallel", "parallel", "arbitrary"),
            # ~18 MiB of double-buffered blocks + scratch at 512 tiles;
            # 48 MiB is safe even on v7x (64 MiB physical VMEM).
            vmem_limit_bytes=48 * MIB),
        cost_estimate=cost,
    )(x2d, Wq, Wk, Wv,
      bq.reshape(1, Dout), bk.reshape(1, Dout), bv.reshape(1, Dout))


# ----------------------------- output projection ----------------------------

def _linear_kernel(x_ref, w_ref, b_ref, o_ref, acc_ref):
    """y = x @ W^T + b, K-reduction over grid axis 2."""
    @pl.when(pl.program_id(2) == 0)
    def _():
        acc_ref[...] = jnp.zeros_like(acc_ref)

    acc_ref[...] += lax.dot_general(
        x_ref[...], w_ref[...],
        dimension_numbers=(((1,), (1,)), ((), ())),
        preferred_element_type=jnp.float32)

    @pl.when(pl.program_id(2) == pl.num_programs(2) - 1)
    def _():
        o_ref[...] = (acc_ref[...] + b_ref[...]).astype(o_ref.dtype)


def linear_pallas(x2d, W, b, *, tm=512, tn=512, tk=512):
    """x2d: (M, Din); W: (Dout, Din) torch layout; b: (Dout,)."""
    M, Din = x2d.shape
    Dout = W.shape[0]
    tm = _pick_tile(M, tm, _sublane_align(x2d.dtype))
    tn = _pick_tile(Dout, tn, 128)
    tk = _pick_tile(Din, tk, 128)
    grid = (M // tm, Dout // tn, Din // tk)

    cost = pl.CostEstimate(
        flops=2 * M * Dout * Din,
        transcendentals=0,
        bytes_accessed=4 * (M * Din + Dout * Din + M * Dout + Dout))

    return pl.pallas_call(
        _linear_kernel,
        out_shape=jax.ShapeDtypeStruct((M, Dout), x2d.dtype),
        grid_spec=pltpu.PrefetchScalarGridSpec(
            num_scalar_prefetch=0,
            grid=grid,
            in_specs=[
                pl.BlockSpec((tm, tk), lambda i, j, k: (i, k)),
                pl.BlockSpec((tn, tk), lambda i, j, k: (j, k)),
                pl.BlockSpec((1, tn), lambda i, j, k: (0, j)),
            ],
            out_specs=pl.BlockSpec((tm, tn), lambda i, j, k: (i, j)),
            scratch_shapes=[pltpu.VMEM((tm, tn), jnp.float32)]),
        compiler_params=pltpu.CompilerParams(
            dimension_semantics=("parallel", "parallel", "arbitrary"),
            vmem_limit_bytes=48 * MIB),
        cost_estimate=cost,
    )(x2d, W, b.reshape(1, Dout))


# ----------------------------- flash attention ------------------------------

def _flash_attn_kernel(q_ref, k_ref, v_ref, o_ref, m_ref, l_ref, acc_ref):
    """Online-softmax attention for one (batch, head, q-tile); KV axis is the
    innermost ('arbitrary') grid axis. Scores (tq, tkv) only — never (S, S).
    The 1/sqrt(d_k) scale is pre-folded into Wq/bq."""
    ki = pl.program_id(3)

    @pl.when(ki == 0)
    def _():
        m_ref[...] = jnp.full_like(m_ref, -jnp.inf)
        l_ref[...] = jnp.zeros_like(l_ref)
        acc_ref[...] = jnp.zeros_like(acc_ref)

    q = q_ref[0, 0]          # (tq, dk)
    k = k_ref[0, 0]          # (tkv, dk)
    v = v_ref[0, 0]          # (tkv, dk)

    # Contract last dims directly — no materialized k.T / XLU transpose.
    s = lax.dot_general(q, k, dimension_numbers=(((1,), (1,)), ((), ())),
                        preferred_element_type=jnp.float32)    # (tq, tkv)

    m_prev = m_ref[...]
    m_new = jnp.maximum(m_prev, jnp.max(s, axis=-1, keepdims=True))
    alpha = jnp.exp(m_prev - m_new)
    p = jnp.exp(s - m_new)

    l_ref[...] = alpha * l_ref[...] + jnp.sum(p, axis=-1, keepdims=True)
    acc_ref[...] = alpha * acc_ref[...] + lax.dot_general(
        p.astype(v.dtype), v, dimension_numbers=(((1,), (0,)), ((), ())),
        preferred_element_type=jnp.float32)
    m_ref[...] = m_new

    @pl.when(ki == pl.num_programs(3) - 1)
    def _():
        denom = l_ref[...]
        # EUP approximate reciprocal + one Newton step (~f32 precision,
        # no VPU divide); 1/l folded into the final store.
        inv = pl.reciprocal(denom, approx=True)
        inv = inv * (2.0 - denom * inv)
        o_ref[0, 0] = (acc_ref[...] * inv).astype(o_ref.dtype)
    # TODO(synk): with d_k < 128 the output store is lane-sparse (masked vst);
    # a lane-dense (S, H*d_k) output slab would need all heads per grid step,
    # which conflicts with the per-head megacore split chosen here.


def attention_pallas(Qh, Kh, Vh, *, tq=256, tkv=512):
    """Qh/Kh/Vh: (B, H, S, d_k). Flash attention, one grid step per
    (batch, head, q-tile, kv-tile); kv axis is the reduction axis."""
    B, H, S, dk = Qh.shape
    sl = _sublane_align(Qh.dtype)
    tq = _pick_tile(S, tq, sl)
    tkv = _pick_tile(S, tkv, sl)
    grid = (B, H, S // tq, S // tkv)

    q_spec = pl.BlockSpec((1, 1, tq, dk), lambda b, h, qi, ki: (b, h, qi, 0))
    kv_spec = pl.BlockSpec((1, 1, tkv, dk), lambda b, h, qi, ki: (b, h, ki, 0))
    o_spec = pl.BlockSpec((1, 1, tq, dk), lambda b, h, qi, ki: (b, h, qi, 0))

    n_q = S // tq
    cost = pl.CostEstimate(
        flops=4 * B * H * S * S * dk,
        transcendentals=B * H * S * S,
        bytes_accessed=4 * B * H * S * dk * (2 + 2 * n_q))

    return pl.pallas_call(
        _flash_attn_kernel,
        out_shape=jax.ShapeDtypeStruct((B, H, S, dk), Qh.dtype),
        grid_spec=pltpu.PrefetchScalarGridSpec(
            num_scalar_prefetch=0,
            grid=grid,
            in_specs=[q_spec, kv_spec, kv_spec],
            out_specs=o_spec,
            scratch_shapes=[pltpu.VMEM((tq, 1), jnp.float32),   # running max
                            pltpu.VMEM((tq, 1), jnp.float32),   # running sum
                            pltpu.VMEM((tq, dk), jnp.float32)]),  # PV acc
        compiler_params=pltpu.CompilerParams(
            dimension_semantics=("parallel", "parallel", "parallel", "arbitrary"),
            vmem_limit_bytes=32 * MIB),
        cost_estimate=cost,
    )(Qh, Kh, Vh)


# ----------------------------- wrappers -------------------------------------

def prepare_params(params, num_heads):
    """One-time parameter prep (outside the hot path): fold 1/sqrt(d_k) into
    the Q projection so the attention kernel does no per-step scaling."""
    d_model = params["Wq"].shape[0]
    scale = 1.0 / math.sqrt(d_model // num_heads)
    return {
        "Wq": params["Wq"] * scale, "bq": params["bq"] * scale,
        "Wk": params["Wk"], "bk": params["bk"],
        "Wv": params["Wv"], "bv": params["bv"],
        "Wo": params["Wo"], "bo": params["bo"],
    }


def multi_head_attention_forward(x, fp, num_heads):
    """Pallas implementation of MultiHeadAttention.forward (eval mode)."""
    B, S, D = x.shape
    d_k = D // num_heads
    x2d = x.reshape(B * S, D)

    # Fused Q/K/V projection: one kernel launch, three separate outputs
    # (no (M, 3D) column slicing in the wrapper).
    Q, K, V = qkv_proj_pallas(x2d, fp["Wq"], fp["Wk"], fp["Wv"],
                              fp["bq"], fp["bk"], fp["bv"])

    # Reproduce torch's .view(B, H, S, d_k) — plain row-major reinterpretation.
    Qh = Q.reshape(B, num_heads, S, d_k)
    Kh = K.reshape(B, num_heads, S, d_k)
    Vh = V.reshape(B, num_heads, S, d_k)

    attn = attention_pallas(Qh, Kh, Vh)          # (B, H, S, d_k)
    attn2d = attn.reshape(B * S, D)              # .contiguous().view(B, S, D)

    out = linear_pallas(attn2d, fp["Wo"], fp["bo"]).reshape(B, S, D)
    # TODO(synk): nn.Dropout(0.1) is identity in eval mode; training-mode RNG
    # mask not implemented. atten_mask=None path only.
    return out


# ----------------------------- reference (pure JAX) -------------------------

def _reference_forward(x, params, num_heads):
    B, S, D = x.shape
    d_k = D // num_heads
    Q = x @ params["Wq"].T + params["bq"]
    K = x @ params["Wk"].T + params["bk"]
    V = x @ params["Wv"].T + params["bv"]
    Qh = Q.reshape(B, num_heads, S, d_k)
    Kh = K.reshape(B, num_heads, S, d_k)
    Vh = V.reshape(B, num_heads, S, d_k)
    scores = jnp.einsum("bhqd,bhkd->bhqk", Qh, Kh) / math.sqrt(d_k)
    p = jax.nn.softmax(scores, axis=-1)
    attn = jnp.einsum("bhqk,bhkd->bhqd", p, Vh).reshape(B, S, D)
    return attn @ params["Wo"].T + params["bo"]


# ----------------------------- main -----------------------------------------

if __name__ == "__main__":
    B, S, d_model, num_heads = 2, 8, 32, 4

    key = jax.random.PRNGKey(0)
    keys = jax.random.split(key, 9)
    bound = 1.0 / math.sqrt(d_model)  # torch.nn.Linear default init range

    def u(k, shape):
        return jax.random.uniform(k, shape, jnp.float32, -bound, bound)

    params = {
        "Wq": u(keys[0], (d_model, d_model)), "bq": u(keys[1], (d_model,)),
        "Wk": u(keys[2], (d_model, d_model)), "bk": u(keys[3], (d_model,)),
        "Wv": u(keys[4], (d_model, d_model)), "bv": u(keys[5], (d_model,)),
        "Wo": u(keys[6], (d_model, d_model)), "bo": u(keys[7], (d_model,)),
    }
    x = jax.random.normal(keys[8], (B, S, d_model), jnp.float32)

    fused = prepare_params(params, num_heads)   # one-time prep (not hot path)

    out = multi_head_attention_forward(x, fused, num_heads)
    out = jax.block_until_ready(out)

    ref = _reference_forward(x, params, num_heads)
    assert out.shape == (B, S, d_model)
    # Slightly looser than 1e-5 to allow for the scale-folded Q projection and
    # the EUP approximate-reciprocal (+Newton) softmax normalization.
    assert jnp.allclose(out, ref, atol=1e-4, rtol=1e-4), "mismatch vs reference"

    print("KERNEL_OK")
</pallas_src>

<mosaic_0001>
module attributes {stable_mosaic.version = 11 : i64} {
  func.func @_qkv_kernel(%arg0: i32, %arg1: i32, %arg2: i32, %arg3: memref<16x32xf32, #tpu.memory_space<vmem>>, %arg4: memref<32x32xf32, #tpu.memory_space<vmem>>, %arg5: memref<32x32xf32, #tpu.memory_space<vmem>>, %arg6: memref<32x32xf32, #tpu.memory_space<vmem>>, %arg7: memref<1x32xf32, #tpu.memory_space<vmem>>, %arg8: memref<1x32xf32, #tpu.memory_space<vmem>>, %arg9: memref<1x32xf32, #tpu.memory_space<vmem>>, %arg10: memref<16x32xf32, #tpu.memory_space<vmem>>, %arg11: memref<16x32xf32, #tpu.memory_space<vmem>>, %arg12: memref<16x32xf32, #tpu.memory_space<vmem>>, %arg13: memref<16x32xf32, #tpu.memory_space<vmem>>, %arg14: memref<16x32xf32, #tpu.memory_space<vmem>>, %arg15: memref<16x32xf32, #tpu.memory_space<vmem>>) attributes {dimension_semantics = [#tpu.dimension_semantics<parallel>, #tpu.dimension_semantics<parallel>, #tpu.dimension_semantics<arbitrary>], iteration_bounds = array<i64: 1, 1, 1>, scalar_prefetch = 0 : i64, scratch_operands = 3 : i64, tpu.core_type = #tpu.core_type<tc>, window_params = [{transform_indices = @transform_0, window_bounds = array<i64: 16, 32>}, {transform_indices = @transform_1, window_bounds = array<i64: 32, 32>}, {transform_indices = @transform_2, window_bounds = array<i64: 32, 32>}, {transform_indices = @transform_3, window_bounds = array<i64: 32, 32>}, {transform_indices = @transform_4, window_bounds = array<i64: 1, 32>}, {transform_indices = @transform_5, window_bounds = array<i64: 1, 32>}, {transform_indices = @transform_6, window_bounds = array<i64: 1, 32>}, {transform_indices = @transform_7, window_bounds = array<i64: 16, 32>}, {transform_indices = @transform_8, window_bounds = array<i64: 16, 32>}, {transform_indices = @transform_9, window_bounds = array<i64: 16, 32>}]} {
    %c0_i32 = arith.constant 0 : i32
    %0 = arith.cmpi eq, %arg2, %c0_i32 : i32
    %1 = arith.extui %0 : i1 to i32
    %c0_i32_0 = arith.constant 0 : i32
    %2 = arith.cmpi ne, %1, %c0_i32_0 : i32
    scf.if %2 {
      %cst_24 = arith.constant 0.000000e+00 : f32
      %22 = vector.broadcast %cst_24 : f32 to vector<16x32xf32>
      %c0_25 = arith.constant 0 : index
      %c0_26 = arith.constant 0 : index
      %23 = vector.load %arg13[%c0_25, %c0_26] : memref<16x32xf32, #tpu.memory_space<vmem>>, vector<16x32xf32>
      tpu.vector_store %arg13[%c0_25, %c0_26], %22 {strides = array<i32>} : memref<16x32xf32, #tpu.memory_space<vmem>>, vector<16x32xf32>,
      %cst_27 = arith.constant 0.000000e+00 : f32
      %24 = vector.broadcast %cst_27 : f32 to vector<16x32xf32>
      %c0_28 = arith.constant 0 : index
      %c0_29 = arith.constant 0 : index
      %25 = vector.load %arg14[%c0_28, %c0_29] : memref<16x32xf32, #tpu.memory_space<vmem>>, vector<16x32xf32>
      tpu.vector_store %arg14[%c0_28, %c0_29], %24 {strides = array<i32>} : memref<16x32xf32, #tpu.memory_space<vmem>>, vector<16x32xf32>,
      %cst_30 = arith.constant 0.000000e+00 : f32
      %26 = vector.broadcast %cst_30 : f32 to vector<16x32xf32>
      %c0_31 = arith.constant 0 : index
      %c0_32 = arith.constant 0 : index
      %27 = vector.load %arg15[%c0_31, %c0_32] : memref<16x32xf32, #tpu.memory_space<vmem>>, vector<16x32xf32>
      tpu.vector_store %arg15[%c0_31, %c0_32], %26 {strides = array<i32>} : memref<16x32xf32, #tpu.memory_space<vmem>>, vector<16x32xf32>,
    } else {
    }
    %c0 = arith.constant 0 : index
    %c0_1 = arith.constant 0 : index
    %3 = vector.load %arg3[%c0, %c0_1] : memref<16x32xf32, #tpu.memory_space<vmem>>, vector<16x32xf32>
    %c0_2 = arith.constant 0 : index
    %c0_3 = arith.constant 0 : index
    %4 = vector.load %arg13[%c0_2, %c0_3] : memref<16x32xf32, #tpu.memory_space<vmem>>, vector<16x32xf32>
    %c0_4 = arith.constant 0 : index
    %c0_5 = arith.constant 0 : index
    %5 = vector.load %arg4[%c0_4, %c0_5] : memref<32x32xf32, #tpu.memory_space<vmem>>, vector<32x32xf32>
    %cst = arith.constant dense<0.000000e+00> : vector<16x32xf32>
    %6 = tpu.matmul %3, %5, %cst {dimension_numbers = #tpu.dot_dimension_numbers<[1], [1], [0], [0], [0, 0, 1, 0], [], []>} : vector<16x32xf32>, vector<32x32xf32>, vector<16x32xf32> -> vector<16x32xf32>
    %7 = arith.addf %4, %6 : vector<16x32xf32>
    %c0_6 = arith.constant 0 : index
    %c0_7 = arith.constant 0 : index
    %8 = vector.load %arg13[%c0_6, %c0_7] : memref<16x32xf32, #tpu.memory_space<vmem>>, vector<16x32xf32>
    tpu.vector_store %arg13[%c0_6, %c0_7], %7 {strides = array<i32>} : memref<16x32xf32, #tpu.memory_space<vmem>>, vector<16x32xf32>,
    %c0_8 = arith.constant 0 : index
    %c0_9 = arith.constant 0 : index
    %9 = vector.load %arg14[%c0_8, %c0_9] : memref<16x32xf32, #tpu.memory_space<vmem>>, vector<16x32xf32>
    %c0_10 = arith.constant 0 : index
    %c0_11 = arith.constant 0 : index
    %10 = vector.load %arg5[%c0_10, %c0_11] : memref<32x32xf32, #tpu.memory_space<vmem>>, vector<32x32xf32>
    %cst_12 = arith.constant dense<0.000000e+00> : vector<16x32xf32>
    %11 = tpu.matmul %3, %10, %cst_12 {dimension_numbers = #tpu.dot_dimension_numbers<[1], [1], [0], [0], [0, 0, 1, 0], [], []>} : vector<16x32xf32>, vector<32x32xf32>, vector<16x32xf32> -> vector<16x32xf32>
    %12 = arith.addf %9, %11 : vector<16x32xf32>
    %c0_13 = arith.constant 0 : index
    %c0_14 = arith.constant 0 : index
    %13 = vector.load %arg14[%c0_13, %c0_14] : memref<16x32xf32, #tpu.memory_space<vmem>>, vector<16x32xf32>
    tpu.vector_store %arg14[%c0_13, %c0_14], %12 {strides = array<i32>} : memref<16x32xf32, #tpu.memory_space<vmem>>, vector<16x32xf32>,
    %c0_15 = arith.constant 0 : index
    %c0_16 = arith.constant 0 : index
    %14 = vector.load %arg15[%c0_15, %c0_16] : memref<16x32xf32, #tpu.memory_space<vmem>>, vector<16x32xf32>
    %c0_17 = arith.constant 0 : index
    %c0_18 = arith.constant 0 : index
    %15 = vector.load %arg6[%c0_17, %c0_18] : memref<32x32xf32, #tpu.memory_space<vmem>>, vector<32x32xf32>
    %cst_19 = arith.constant dense<0.000000e+00> : vector<16x32xf32>
    %16 = tpu.matmul %3, %15, %cst_19 {dimension_numbers = #tpu.dot_dimension_numbers<[1], [1], [0], [0], [0, 0, 1, 0], [], []>} : vector<16x32xf32>, vector<32x32xf32>, vector<16x32xf32> -> vector<16x32xf32>
    %17 = arith.addf %14, %16 : vector<16x32xf32>
    %c0_20 = arith.constant 0 : index
    %c0_21 = arith.constant 0 : index
    %18 = vector.load %arg15[%c0_20, %c0_21] : memref<16x32xf32, #tpu.memory_space<vmem>>, vector<16x32xf32>
    tpu.vector_store %arg15[%c0_20, %c0_21], %17 {strides = array<i32>} : memref<16x32xf32, #tpu.memory_space<vmem>>, vector<16x32xf32>,
    %c0_i32_22 = arith.constant 0 : i32
    %19 = arith.cmpi eq, %arg2, %c0_i32_22 : i32
    %20 = arith.extui %19 : i1 to i32
    %c0_i32_23 = arith.constant 0 : i32
    %21 = arith.cmpi ne, %20, %c0_i32_23 : i32
    scf.if %21 {
      %c0_24 = arith.constant 0 : index
      %c0_25 = arith.constant 0 : index
      %22 = vector.load %arg13[%c0_24, %c0_25] : memref<16x32xf32, #tpu.memory_space<vmem>>, vector<16x32xf32>
      %c0_26 = arith.constant 0 : index
      %c0_27 = arith.constant 0 : index
      %23 = vector.load %arg7[%c0_26, %c0_27] : memref<1x32xf32, #tpu.memory_space<vmem>>, vector<1x32xf32>
      %24 = vector.broadcast %23 : vector<1x32xf32> to vector<16x32xf32>
      %25 = arith.addf %22, %24 : vector<16x32xf32>
      %c0_28 = arith.constant 0 : index
      %c0_29 = arith.constant 0 : index
      %26 = vector.load %arg10[%c0_28, %c0_29] : memref<16x32xf32, #tpu.memory_space<vmem>>, vector<16x32xf32>
      tpu.vector_store %arg10[%c0_28, %c0_29], %25 {strides = array<i32>} : memref<16x32xf32, #tpu.memory_space<vmem>>, vector<16x32xf32>,
      %c0_30 = arith.constant 0 : index
      %c0_31 = arith.constant 0 : index
      %27 = vector.load %arg14[%c0_30, %c0_31] : memref<16x32xf32, #tpu.memory_space<vmem>>, vector<16x32xf32>
      %c0_32 = arith.constant 0 : index
      %c0_33 = arith.constant 0 : index
      %28 = vector.load %arg8[%c0_32, %c0_33] : memref<1x32xf32, #tpu.memory_space<vmem>>, vector<1x32xf32>
      %29 = vector.broadcast %28 : vector<1x32xf32> to vector<16x32xf32>
      %30 = arith.addf %27, %29 : vector<16x32xf32>
      %c0_34 = arith.constant 0 : index
      %c0_35 = arith.constant 0 : index
      %31 = vector.load %arg11[%c0_34, %c0_35] : memref<16x32xf32, #tpu.memory_space<vmem>>, vector<16x32xf32>
      tpu.vector_store %arg11[%c0_34, %c0_35], %30 {strides = array<i32>} : memref<16x32xf32, #tpu.memory_space<vmem>>, vector<16x32xf32>,
      %c0_36 = arith.constant 0 : index
      %c0_37 = arith.constant 0 : index
      %32 = vector.load %arg15[%c0_36, %c0_37] : memref<16x32xf32, #tpu.memory_space<vmem>>, vector<16x32xf32>
      %c0_38 = arith.constant 0 : index
      %c0_39 = arith.constant 0 : index
      %33 = vector.load %arg9[%c0_38, %c0_39] : memref<1x32xf32, #tpu.memory_space<vmem>>, vector<1x32xf32>
      %34 = vector.broadcast %33 : vector<1x32xf32> to vector<16x32xf32>
      %35 = arith.addf %32, %34 : vector<16x32xf32>
      %c0_40 = arith.constant 0 : index
      %c0_41 = arith.constant 0 : index
      %36 = vector.load %arg12[%c0_40, %c0_41] : memref<16x32xf32, #tpu.memory_space<vmem>>, vector<16x32xf32>
      tpu.vector_store %arg12[%c0_40, %c0_41], %35 {strides = array<i32>} : memref<16x32xf32, #tpu.memory_space<vmem>>, vector<16x32xf32>,
    } else {
    }
    return
  }
  func.func @transform_0(%arg0: i32, %arg1: i32, %arg2: i32) -> (i32, i32) {
    %c0_i32 = arith.constant 0 : i32
    return %arg0, %arg2 : i32, i32
  }
  func.func @transform_1(%arg0: i32, %arg1: i32, %arg2: i32) -> (i32, i32) {
    %c0_i32 = arith.constant 0 : i32
    return %arg1, %arg2 : i32, i32
  }
  func.func @transform_2(%arg0: i32, %arg1: i32, %arg2: i32) -> (i32, i32) {
    %c0_i32 = arith.constant 0 : i32
    return %arg1, %arg2 : i32, i32
  }
  func.func @transform_3(%arg0: i32, %arg1: i32, %arg2: i32) -> (i32, i32) {
    %c0_i32 = arith.constant 0 : i32
    return %arg1, %arg2 : i32, i32
  }
  func.func @transform_4(%arg0: i32, %arg1: i32, %arg2: i32) -> (i32, i32) {
    %c0_i32 = arith.constant 0 : i32
    %c0_i32_0 = arith.constant 0 : i32
    return %c0_i32, %arg1 : i32, i32
  }
  func.func @transform_5(%arg0: i32, %arg1: i32, %arg2: i32) -> (i32, i32) {
    %c0_i32 = arith.constant 0 : i32
    %c0_i32_0 = arith.constant 0 : i32
    return %c0_i32, %arg1 : i32, i32
  }
  func.func @transform_6(%arg0: i32, %arg1: i32, %arg2: i32) -> (i32, i32) {
    %c0_i32 = arith.constant 0 : i32
    %c0_i32_0 = arith.constant 0 : i32
    return %c0_i32, %arg1 : i32, i32
  }
  func.func @transform_7(%arg0: i32, %arg1: i32, %arg2: i32) -> (i32, i32) {
    %c0_i32 = arith.constant 0 : i32
    return %arg0, %arg1 : i32, i32
  }
  func.func @transform_8(%arg0: i32, %arg1: i32, %arg2: i32) -> (i32, i32) {
    %c0_i32 = arith.constant 0 : i32
    return %arg0, %arg1 : i32, i32
  }
  func.func @transform_9(%arg0: i32, %arg1: i32, %arg2: i32) -> (i32, i32) {
    %c0_i32 = arith.constant 0 : i32
    return %arg0, %arg1 : i32, i32
  }
}

</mosaic_0001>

<bundles_post_ra>
// kernel: tpu_custom_call.1
= control target key start
LH: loop header
LB: loop body
LE: loop exit
PB: predicated region body
PF: predicated region fallthrough
CT: control target
= control target key end

     0   :  { %15 = vsyncpa [#allocation6], 0  ;;  %s1020_s0 = inlined_call_operand.hbm [shape: f32[16,32], index: 0, kind: input, shape index: {}]   ;;  %s1021_s1 = inlined_call_operand.hbm [shape: f32[32,32], index: 1, kind: input, shape index: {}]   ;;  %s1022_s2 = inlined_call_operand.hbm [shape: f32[32,32], index: 2, kind: input, shape index: {}]   ;;  %s1023_s3 = inlined_call_operand.hbm [shape: f32[32,32], index: 3, kind: input, shape index: {}]   ;;  %s1024_s4 = inlined_call_operand.vmem [shape: f32[1,32], index: 4, kind: input, shape index: {}]   ;;  %s1025_s5 = inlined_call_operand.vmem [shape: f32[1,32], index: 5, kind: input, shape index: {}]   ;;  %s1026_s6 = inlined_call_operand.vmem [shape: f32[1,32], index: 6, kind: input, shape index: {}]   ;;  %s1027_s7 = inlined_call_operand.hbm [shape: f32[16,32], index: 7, kind: output, shape index: {0}]   ;;  %s1028_s8 = inlined_call_operand.hbm [shape: f32[16,32], index: 8, kind: output, shape index: {1}]   ;;  %s1029_s9 = inlined_call_operand.hbm [shape: f32[16,32], index: 9, kind: output, shape index: {2}]  }
   0x1   :  { %16 = vsyncpa [#allocation9], 0 }
   0x2   :  { %17 = vsyncpa [#allocation12], 0 }
   0x3   :  { %18 = vsyncpa [#allocation7], 0 }
   0x4   :  { %19 = vsyncpa [#allocation15], 0  ;;  %s771_s30 = smov [#allocation8]   ;;  %s772_s11 = smov [#allocation5]  }
   0x5   :  { %s37_s10 = sshll.u32 %s771_s30, 4  ;;  %s25_s12 = sshll.u32 %s772_s11, 4  ;;  %s38_s10 = int_to_ptr.vmem [resolvable:$true] %s37_s10  ;;  %s831_s12 = int_to_ptr.vmem [resolvable:$true] %s25_s12 }
   0x6   :  { %s607_s15 = scalar_lea.hbm %s1021_s1, 512 }
   0x7   :  { %p608_p0 = scmp.ne.s32.totalorder %s1021_s1, %s607_s15  ;;  %p611_p1 = scmp.lt.u32.totalorder %s607_s15, %s1021_s1 }
   0x9   :  { %p613_p2 = pnand %p611_p1, %p608_p0 }
   0xb   :  { %616 = shalt.err (!%p613_p2)
}
   0xc   :  { %s617_s20 = scalar_lea.vmem %s38_s10, 512  ;;  %p622_p4 = scmp.lt.s32.totalorder %s38_s10, %s38_s10 }
   0xd   :  { %p618_p3 = scmp.ne.s32.totalorder %s38_s10, %s617_s20  ;;  %p623_p5 = scmp.lt.s32.totalorder %s617_s20, %s617_s20 }
   0xf   :  { %p624_p6 = por %p623_p5, %p622_p4 }
  0x11   :  { %p625_p7 = pnand %p624_p6, %p618_p3 }
  0x13   :  { %628 = shalt.err (!%p625_p7)
}
  0x14   :  { %s773_s21 = smov 128   ;;  %s774_s22 = smov 8  }
  0x15   :  { %43 = dma.hbm_to_vmem [thread:$0]  %s1021_s1, 512, %s38_s10, [#allocation9], %s773_s21, %s773_s21, %s774_s22  }
  0x16   :  { %s629_s27 = scalar_lea.hbm %s1020_s0, 256 }
  0x17   :  { %p630_p8 = scmp.ne.s32.totalorder %s1020_s0, %s629_s27  ;;  %p633_p9 = scmp.lt.u32.totalorder %s629_s27, %s1020_s0 }
  0x19   :  { %p635_p10 = pnand %p633_p9, %p630_p8 }
  0x1b   :  { %638 = shalt.err (!%p635_p10)
}
  0x1c   :  { %s639_s13 = scalar_lea.vmem %s831_s12, 256  ;;  %p644_p12 = scmp.lt.s32.totalorder %s831_s12, %s831_s12 }
  0x1d   :  { %p640_p11 = scmp.ne.s32.totalorder %s831_s12, %s639_s13  ;;  %p645_p13 = scmp.lt.s32.totalorder %s639_s13, %s639_s13 }
  0x1f   :  { %p646_p0 = por %p645_p13, %p644_p12 }
  0x21   :  { %p647_p1 = pnand %p646_p0, %p640_p11 }
  0x23   :  { %650 = shalt.err (!%p647_p1)
}
  0x24   :  { %31 = dma.hbm_to_vmem [thread:$0]  %s1020_s0, 256, %s831_s12, [#allocation6], %s773_s21, %s773_s21, %s774_s22  }
  0x25   :  { %s775_s14 = smov [#allocation10]   ;;  %s776_s16 = smov [#allocation11]  }
  0x26   :  { %s49_s15 = sshll.u32 %s775_s14, 4  ;;  %s61_s17 = sshll.u32 %s776_s16, 4  ;;  %s50_s15 = int_to_ptr.vmem [resolvable:$true] %s49_s15  ;;  %s868_s17 = int_to_ptr.vmem [resolvable:$true] %s61_s17 }
  0x27   :  { %s651_s20 = scalar_lea.hbm %s1022_s2, 512 }
  0x28   :  { %p652_p2 = scmp.ne.s32.totalorder %s1022_s2, %s651_s20  ;;  %p655_p3 = scmp.lt.u32.totalorder %s651_s20, %s1022_s2 }
  0x2a   :  { %p657_p4 = pnand %p655_p3, %p652_p2 }
  0x2c   :  { %660 = shalt.err (!%p657_p4)
}
  0x2d   :  { %s661_s0 = scalar_lea.vmem %s50_s15, 512  ;;  %p666_p6 = scmp.lt.s32.totalorder %s50_s15, %s50_s15 }
  0x2e   :  { %p662_p5 = scmp.ne.s32.totalorder %s50_s15, %s661_s0  ;;  %p667_p7 = scmp.lt.s32.totalorder %s661_s0, %s661_s0 }
  0x30   :  { %p668_p8 = por %p667_p7, %p666_p6 }
  0x32   :  { %p669_p9 = pnand %p668_p8, %p662_p5 }
  0x34   :  { %672 = shalt.err (!%p669_p9)
}
  0x35   :  { %55 = dma.hbm_to_vmem [thread:$0]  %s1022_s2, 512, %s50_s15, [#allocation9], %s773_s21, %s773_s21, %s774_s22  }
  0x36   :  { %s673_s30 = scalar_lea.hbm %s1023_s3, 512 }
  0x37   :  { %p674_p10 = scmp.ne.s32.totalorder %s1023_s3, %s673_s30  ;;  %p677_p11 = scmp.lt.u32.totalorder %s673_s30, %s1023_s3 }
  0x39   :  { %p679_p12 = pnand %p677_p11, %p674_p10 }
  0x3b   :  { %682 = shalt.err (!%p679_p12)
}
  0x3c   :  { %s683_s14 = scalar_lea.vmem %s868_s17, 512  ;;  %p688_p0 = scmp.lt.s32.totalorder %s868_s17, %s868_s17 }
  0x3d   :  { %p684_p13 = scmp.ne.s32.totalorder %s868_s17, %s683_s14  ;;  %p689_p1 = scmp.lt.s32.totalorder %s683_s14, %s683_s14 }
  0x3f   :  { %p690_p2 = por %p689_p1, %p688_p0 }
  0x41   :  { %p691_p3 = pnand %p690_p2, %p684_p13 }
  0x43   :  { %694 = shalt.err (!%p691_p3)
}
  0x44   :  { %67 = dma.hbm_to_vmem [thread:$0]  %s1023_s3, 512, %s868_s17, [#allocation12], %s773_s21, %s773_s21, %s774_s22  }
  0x45   :  { %761 = dma.done.wait [#allocation6], 256  }
  0x46   :  { %762 = vsyncadd [#allocation6], 4294967040 }
  0x47   :  { %763 = dma.done.wait [#allocation9], 1024  }
  0x48   :  { %764 = vsyncadd [#allocation9], 4294966272 }
  0x49   :  { %765 = dma.done.wait [#allocation12], 512  }
  0x4a   :  { %766 = vsyncadd [#allocation12], 4294966784  ;;  %vm90_vm0 = vcmask 261120   ;;  %v777_v0 = vmov 0.0   ;;  %v101_v2 = vld [vmem:[#allocation8] sm:$0xff]  ;;  %v102_v3 = vld [vmem:[#allocation8 + $0x8] sm:$0xff] }
  0x4b   :  { %92 = vst.msk [vmem:[#allocation2 + $0x8] sm:$0xff] %vm90_vm0, %v777_v0  ;;  %91 = vst.msk [vmem:[#allocation2] sm:$0xff] %vm90_vm0, %v777_v0  ;;  %v103_v4 = vld [vmem:[#allocation8 + $0x10] sm:$0xff]  ;;  %v561_v5 = vpack.c.bf16 %v102_v3, %v101_v2  ;;  %v104_v6 = vld [vmem:[#allocation8 + $0x18] sm:$0xff]  ;;  %s778_s19 = smov [#allocation13]   ;;  %s779_s23 = smov [#allocation14]  }
  0x4c   :  { %93 = vst.msk [vmem:[#allocation3] sm:$0xff] %vm90_vm0, %v777_v0  ;;  %94 = vst.msk [vmem:[#allocation3 + $0x8] sm:$0xff] %vm90_vm0, %v777_v0  ;;  %v205_v7 = vld [vmem:[#allocation10] sm:$0xff]  ;;  %v206_v8 = vld [vmem:[#allocation10 + $0x8] sm:$0xff]  ;;  %v567_v9 = vpack.c.bf16 %v104_v6, %v103_v4  ;;  %s444_s20 = sshll.u32 %s778_s19, 4  ;;  %s456_s24 = sshll.u32 %s779_s23, 4  ;;  %s445_s20 = int_to_ptr.vmem [resolvable:$true] %s444_s20  ;;  %s957_s24 = int_to_ptr.vmem [resolvable:$true] %s456_s24 }
  0x4d   :  { %95 = vst.msk [vmem:[#allocation4] sm:$0xff] %vm90_vm0, %v777_v0  ;;  %96 = vst.msk [vmem:[#allocation4 + $0x8] sm:$0xff] %vm90_vm0, %v777_v0  ;;  %v573_v10 = vpack.c.bf16 %v206_v8, %v205_v7  ;;  %v97_v11 = vld [vmem:[#allocation5] sm:$0xff]  ;;  %v208_v13 = vld [vmem:[#allocation10 + $0x18] sm:$0xff]  ;;  %p700_p5 = scmp.lt.s32.totalorder %s445_s20, %s445_s20 }
  0x4e   :  { %vm913_vm1 = vmpackc.low %vm90_vm0, %vm90_vm0  ;;  %536 = vmatprep.mubr.msk.f32.mxu0 %vm90_vm0, %v97_v11  ;;  %v207_v12 = vld [vmem:[#allocation10 + $0x10] sm:$0xff]  ;;  %v302_v15 = vld [vmem:[#allocation11] sm:$0xff]  ;;  %547 = vmatprep.mubr.msk.f32.mxu1 %vm90_vm0, %v97_v11 }
  0x4f   :  { %563 = vmatprep.subr.msk.bf16.mxu0 %vm913_vm1, %v561_v5  ;;  %575 = vmatprep.subr.msk.bf16.mxu1 %vm913_vm1, %v573_v10  ;;  %v579_v14 = vpack.c.bf16 %v208_v13, %v207_v12  ;;  %v303_v16 = vld [vmem:[#allocation11 + $0x8] sm:$0xff]  ;;  %v304_v18 = vld [vmem:[#allocation11 + $0x10] sm:$0xff]  ;;  %v305_v19 = vld [vmem:[#allocation11 + $0x18] sm:$0xff] }
  0x50   :  { %566 = vmatpush3.bf16.xpose.msk.msra.mxu0 %vm913_vm1, %v561_v5  ;;  %578 = vmatpush3.bf16.xpose.msk.msra.mxu1 %vm913_vm1, %v573_v10  ;;  %v585_v17 = vpack.c.bf16 %v303_v16, %v302_v15  ;;  %v98_v20 = vld [vmem:[#allocation5 + $0x8] sm:$0xff]  ;;  %v591_v21 = vpack.c.bf16 %v305_v19, %v304_v18  ;;  %v507_v34 = vld [vmem:[%s1024_s4] ss:$0 sm:$0xff]  ;;  %s695_s4 = scalar_lea.vmem %s445_s20, 256 }
  0x51   :  { %569 = vmatprep.subr.msk.bf16.mxu0 %vm913_vm1, %v567_v9  ;;  %581 = vmatprep.subr.msk.bf16.mxu1 %vm913_vm1, %v579_v14  ;;  %v508_v35 = vld [vmem:[%s1025_s5] ss:$0 sm:$0xff]  ;;  %p696_p4 = scmp.ne.s32.totalorder %s445_s20, %s695_s4  ;;  %p701_p6 = scmp.lt.s32.totalorder %s695_s4, %s695_s4 }
  0x52   :  { %v100_v22 = vld [vmem:[#allocation2 + $0x8] sm:$0xff]  ;;  %v99_v23 = vld [vmem:[#allocation2] sm:$0xff] }
  0x53   :  { %v204_v24 = vld [vmem:[#allocation3 + $0x8] sm:$0xff]  ;;  %v203_v26 = vld [vmem:[#allocation3] sm:$0xff]  ;;  %p702_p7 = por %p701_p6, %p700_p5 }
  0x54   :  { %v301_v44 = vld [vmem:[#allocation4 + $0x8] sm:$0xff]  ;;  %v300_v45 = vld [vmem:[#allocation4] sm:$0xff] }
  0x55   :  { %p703_p8 = pnand %p702_p7, %p696_p4 }
  0x58   :  { %572 = vmatpush3.bf16.xpose.msk.msra.mxu0 %vm913_vm1, %v567_v9  ;;  %584 = vmatpush3.bf16.xpose.msk.msra.mxu1 %vm913_vm1, %v579_v14 }
  0x59   :  { %587 = vmatprep.subr.msk.bf16.mxu0 %vm913_vm1, %v585_v17 }
  0x5f   :  { %537 = vmatmul.mubr.msk.f32.vlgmr.msra.gmra.mrb[0].mxu0 %vm90_vm0, %v98_v20  ;;  %548 = vmatmul.mubr.msk.f32.vlgmr.msra.gmra.mrb[0].mxu1 %vm90_vm0, %v98_v20 }
  0x60   :  { %590 = vmatpush3.bf16.xpose.msk.msra.mxu0 %vm913_vm1, %v585_v17  ;;  %558 = vmatprep.mubr.msk.f32.mxu0 %vm90_vm0, %v97_v11 }
  0x61   :  { %593 = vmatprep.subr.msk.bf16.mxu0 %vm913_vm1, %v591_v21 }
  0x68   :  { %596 = vmatpush3.bf16.xpose.msk.msra.mxu0 %vm913_vm1, %v591_v21 }
  0x6f   :  { %559 = vmatmul.mubr.msk.f32.vlgmr.msra.gmra.mrb[2].mxu0 %vm90_vm0, %v98_v20 }
 0x132   :  { %v538_v25 = vpop.f32.mrb[0].mxu0  ;;  %v549_v29 = vpop.f32.mrb[0].mxu1 }
 0x133   :  { %v200_v27 = vadd.f32 %v538_v25, %v100_v22  ;;  %v190_v28 = vpop.f32.mrb[1].mxu0  ;;  %v297_v31 = vadd.f32 %v549_v29, %v204_v24  ;;  %v287_v32 = vpop.f32.mrb[1].mxu1 }
 0x134   :  { %v199_v30 = vadd.f32 %v190_v28, %v99_v23  ;;  %v296_v33 = vadd.f32 %v287_v32, %v203_v26 }
 0x135   :  { %202 = vst.msk [vmem:[#allocation2 + $0x8] sm:$0xff] %vm90_vm0, %v200_v27  ;;  %299 = vst.msk [vmem:[#allocation3 + $0x8] sm:$0xff] %vm90_vm0, %v297_v31 }
 0x136   :  { %201 = vst.msk [vmem:[#allocation2] sm:$0xff] %vm90_vm0, %v199_v30  ;;  %298 = vst.msk [vmem:[#allocation3] sm:$0xff] %vm90_vm0, %v296_v33 }
 0x13c   :  { %v401_v36 = vld [vmem:[#allocation2 + $0x8] sm:$0xff]  ;;  %v414_v37 = vld [vmem:[#allocation3 + $0x8] sm:$0xff] }
 0x13d   :  { %v400_v38 = vld [vmem:[#allocation2] sm:$0xff]  ;;  %v410_v39 = vadd.f32 %v507_v34, %v401_v36  ;;  %v413_v40 = vld [vmem:[#allocation3] sm:$0xff]  ;;  %v423_v41 = vadd.f32 %v508_v35, %v414_v37 }
 0x13e   :  { %v409_v42 = vadd.f32 %v507_v34, %v400_v38  ;;  %v422_v43 = vadd.f32 %v508_v35, %v413_v40 }
 0x13f   :  { %412 = vst.msk [vmem:[#allocation13 + $0x8] sm:$0xff] %vm90_vm0, %v410_v39  ;;  %425 = vst.msk [vmem:[#allocation14 + $0x8] sm:$0xff] %vm90_vm0, %v423_v41 }
 0x140   :  { %411 = vst.msk [vmem:[#allocation13] sm:$0xff] %vm90_vm0, %v409_v42  ;;  %424 = vst.msk [vmem:[#allocation14] sm:$0xff] %vm90_vm0, %v422_v43 }
 0x141   :  { %706 = shalt.err (!%p703_p8)
}
 0x142   :  { %s707_s26 = scalar_lea.hbm %s1027_s7, 256 }
 0x143   :  { %p708_p9 = scmp.ne.s32.totalorder %s1027_s7, %s707_s26  ;;  %p711_p10 = scmp.lt.u32.totalorder %s707_s26, %s1027_s7 }
 0x145   :  { %p713_p11 = pnand %p711_p10, %p708_p9 }
 0x147   :  { %716 = shalt.err (!%p713_p11)
}
 0x148   :  { %450 = dma.vmem_to_hbm [thread:$0]  %s445_s20, 256, %s1027_s7, [#allocation7], %s773_s21, %s773_s21, %s774_s22   ;;  %v560_v46 = vpop.f32.mrb[2].mxu0 }
 0x149   :  { %s717_s11 = scalar_lea.vmem %s957_s24, 256  ;;  %p722_p13 = scmp.lt.s32.totalorder %s957_s24, %s957_s24 }
 0x14a   :  { %p718_p12 = scmp.ne.s32.totalorder %s957_s24, %s717_s11  ;;  %p723_p0 = scmp.lt.s32.totalorder %s717_s11, %s717_s11 }
 0x14c   :  { %p724_p1 = por %p723_p0, %p722_p13 }
 0x14e   :  { %p725_p2 = pnand %p724_p1, %p718_p12 }
 0x150   :  { %728 = shalt.err (!%p725_p2)
}
 0x151   :  { %s729_s10 = scalar_lea.hbm %s1028_s8, 256 }
 0x152   :  { %p730_p3 = scmp.ne.s32.totalorder %s1028_s8, %s729_s10  ;;  %p733_p4 = scmp.lt.u32.totalorder %s729_s10, %s1028_s8 }
 0x154   :  { %p735_p5 = pnand %p733_p4, %p730_p3 }
 0x156   :  { %738 = shalt.err (!%p735_p5)
}
 0x157   :  { %462 = dma.vmem_to_hbm [thread:$0]  %s957_s24, 256, %s1028_s8, [#allocation15], %s773_s21, %s773_s21, %s774_s22   ;;  %v394_v47 = vadd.f32 %v560_v46, %v301_v44  ;;  %v384_v48 = vpop.f32.mrb[3].mxu0 }
 0x158   :  { %v393_v49 = vadd.f32 %v384_v48, %v300_v45  ;;  %v509_v50 = vld [vmem:[%s1026_s6] ss:$0 sm:$0xff]  ;;  %s780_s19 = smov [#allocation16]  }
 0x159   :  { %396 = vst.msk [vmem:[#allocation4 + $0x8] sm:$0xff] %vm90_vm0, %v394_v47  ;;  %s468_s20 = sshll.u32 %s780_s19, 4  ;;  %s469_s20 = int_to_ptr.vmem [resolvable:$true] %s468_s20 }
 0x15a   :  { %395 = vst.msk [vmem:[#allocation4] sm:$0xff] %vm90_vm0, %v393_v49  ;;  %s739_s8 = scalar_lea.vmem %s469_s20, 256  ;;  %p744_p7 = scmp.lt.s32.totalorder %s469_s20, %s469_s20 }
 0x15b   :  { %p740_p6 = scmp.ne.s32.totalorder %s469_s20, %s739_s8  ;;  %p745_p8 = scmp.lt.s32.totalorder %s739_s8, %s739_s8 }
 0x15d   :  { %p746_p9 = por %p745_p8, %p744_p7 }
 0x15f   :  { %p747_p10 = pnand %p746_p9, %p740_p6 }
 0x160   :  { %v427_v51 = vld [vmem:[#allocation4 + $0x8] sm:$0xff] }
 0x161   :  { %v426_v52 = vld [vmem:[#allocation4] sm:$0xff]  ;;  %v436_v53 = vadd.f32 %v509_v50, %v427_v51 }
 0x162   :  { %v435_v54 = vadd.f32 %v509_v50, %v426_v52 }
 0x163   :  { %438 = vst.msk [vmem:[#allocation16 + $0x8] sm:$0xff] %vm90_vm0, %v436_v53 }
 0x164   :  { %437 = vst.msk [vmem:[#allocation16] sm:$0xff] %vm90_vm0, %v435_v54 }
 0x165   :  { %750 = shalt.err (!%p747_p10)
}
 0x166   :  { %s751_s24 = scalar_lea.hbm %s1029_s9, 256 }
 0x167   :  { %p752_p11 = scmp.ne.s32.totalorder %s1029_s9, %s751_s24  ;;  %p755_p12 = scmp.lt.u32.totalorder %s751_s24, %s1029_s9 }
 0x169   :  { %p757_p13 = pnand %p755_p12, %p752_p11 }
 0x16b   :  { %760 = shalt.err (!%p757_p13)
}
 0x16c   :  { %474 = dma.vmem_to_hbm [thread:$0]  %s469_s20, 256, %s1029_s9, [#allocation15], %s773_s21, %s773_s21, %s774_s22  }
 0x16d   :  { %767 = dma.done.wait [#allocation7], 256  }
 0x16e   :  { %768 = vsyncadd [#allocation7], 4294967040 }
 0x16f   :  { %769 = dma.done.wait [#allocation15], 512  }
 0x170   :  { %770 = vsyncadd [#allocation15], 4294966784 }
 0x171   :  { %484 = vsyncpa [#allocation6], 1 }
 0x172   :  { %485 = vsyncpa [#allocation9], 1 }
 0x173   :  { %486 = vsyncpa [#allocation12], 1 }
 0x174   :  { %487 = vsyncpa [#allocation7], 1 }
 0x175   :  { %488 = vsyncpa [#allocation15], 1 }

</bundles_post_ra>
